<compile_context>
chip_gen: v6e
topology: v6e:2x2x1
jax: 0.10.0
libtpu: 0.0.40
codegen_flags: <defaults>
</compile_context>

<pallas_src>
import functools

import jax
import jax.numpy as jnp
from jax import lax
from jax.experimental import pallas as pl
from jax.experimental.pallas import tpu as pltpu

K = 3  # config.CONV_KERNEL_SIZE


def _block_kernel(x_ref, w1_ref, b1_ref, w2_ref, b2_ref, o_ref, h_scr, *, W, ips):
    # x_ref : (ips, Cin, HW + 2*SMAX) bf16  channel-major, spatial-on-lanes, zero-padded
    # w1_ref: (K*K, C1, Cin)          bf16  per-tap (Cout, Cin) blocks, tap t = ky*K + kx
    # b1_ref: (C1, 1)                 f32
    # w2_ref: (K*K, C1, C1)           bf16
    # b2_ref: (C1, 1)                 f32
    # o_ref : (ips, C1, HW)           f32   lane-dense padded-frame output
    # h_scr : (C1, HW + SMAX)         bf16  conv1 activation scratch (written once, read 9x)
    C1, Wh = h_scr.shape
    HW = o_ref.shape[-1]

    for j in range(ips):
        # ---- conv1: 9 shifted channel-major matmuls, f32 accumulation ----
        # The shift for tap (ky, kx) is a lane offset s = ky*W + kx into the
        # padded frame; valid output positions never read wrapped/pad columns.
        acc1 = jnp.zeros((C1, Wh), jnp.float32)
        for ky in range(K):
            for kx in range(K):
                s = ky * W + kx
                xs = x_ref[j, :, s:s + Wh]                       # (Cin, Wh) bf16, lane-offset load
                acc1 = acc1 + jnp.dot(w1_ref[ky * K + kx], xs,
                                      preferred_element_type=jnp.float32)
        # bias + ReLU in f32; single bf16 cast of h before it is re-read 9x.
        h_scr[...] = jnp.maximum(acc1 + b1_ref[...], 0.0).astype(h_scr.dtype)

        # ---- conv2: same pattern over the activation scratch ----
        acc2 = jnp.zeros((C1, HW), jnp.float32)
        for ky in range(K):
            for kx in range(K):
                s = ky * W + kx
                hs = h_scr[:, s:s + HW]                          # (C1, HW) bf16
                acc2 = acc2 + jnp.dot(w2_ref[ky * K + kx], hs,
                                      preferred_element_type=jnp.float32)
        # fully lane-dense store: 256 spatial positions on lanes, C1=8 on sublanes.
        o_ref[j] = jnp.maximum(acc2 + b2_ref[...], 0.0).astype(o_ref.dtype)


def unet_block(x_nchw, w1, b1, w2, b2, *, images_per_step=None):
    """x_nchw: (N, Cin, H, W); w*: (K, K, Cin_or_out, Cout) (HWIO); b*: (Cout,)."""
    N, Cin, H, W = x_nchw.shape
    C1 = w1.shape[-1]
    H1, W1 = H - (K - 1), W - (K - 1)
    H2, W2 = H1 - (K - 1), W1 - (K - 1)
    HW = H * W
    SMAX = (K - 1) * W + (K - 1)          # largest tap shift (row-major, stride W)
    Wh = HW + SMAX                        # conv1-activation width (so conv2 slices stay in-bounds)
    Wx = HW + 2 * SMAX                    # padded input width  (so conv1 slices stay in-bounds)

    if images_per_step is None:
        # Keep >= 2 "parallel" grid steps so both v7x TensorCores get work,
        # while folding larger batches into fewer, fatter steps.
        images_per_step = max(1, N // 2)
        while N % images_per_step:
            images_per_step -= 1
    ips = images_per_step
    assert N % ips == 0
    steps = N // ips

    # NCHW is already channel-major / spatial-minor: flattening spatial puts all
    # H*W pixels on the lane axis with no HBM transpose.  Cast to bf16 once,
    # before any window shifting (no duplicated-patch casting anywhere).
    x_flat = x_nchw.reshape(N, Cin, HW).astype(jnp.bfloat16)
    x_pad = jnp.pad(x_flat, ((0, 0), (0, 0), (0, 2 * SMAX)))

    # Per-tap (Cout, Cin) weight blocks, tap order t = ky*K + kx (matches shifts).
    w1_t = jnp.transpose(w1, (0, 1, 3, 2)).reshape(K * K, C1, Cin).astype(jnp.bfloat16)
    w2_t = jnp.transpose(w2, (0, 1, 3, 2)).reshape(K * K, C1, C1).astype(jnp.bfloat16)
    b1_2d = b1.reshape(C1, 1).astype(jnp.float32)
    b2_2d = b2.reshape(C1, 1).astype(jnp.float32)

    kernel = functools.partial(_block_kernel, W=W, ips=ips)

    out_flat = pl.pallas_call(
        kernel,
        out_shape=jax.ShapeDtypeStruct((N, C1, HW), x_nchw.dtype),
        grid_spec=pltpu.PrefetchScalarGridSpec(
            num_scalar_prefetch=0,
            grid=(steps,),
            in_specs=[
                pl.BlockSpec((ips, Cin, Wx), lambda n: (n, 0, 0)),
                pl.BlockSpec((K * K, C1, Cin), lambda n: (0, 0, 0)),
                pl.BlockSpec((C1, 1), lambda n: (0, 0)),
                pl.BlockSpec((K * K, C1, C1), lambda n: (0, 0, 0)),
                pl.BlockSpec((C1, 1), lambda n: (0, 0)),
            ],
            out_specs=pl.BlockSpec((ips, C1, HW), lambda n: (n, 0, 0)),
            scratch_shapes=[pltpu.VMEM((C1, Wh), jnp.bfloat16)],
        ),
        compiler_params=pltpu.CompilerParams(
            dimension_semantics=("parallel",)),
    )(x_pad, w1_t, b1_2d, w2_t, b2_2d)

    # The kernel writes conv2 in the padded (H, W)-stride frame; slice the valid
    # (H2, W2) window out with XLA (tiny array, keeps the kernel relayout-free).
    return out_flat.reshape(N, C1, H, W)[:, :, :H2, :W2]


def _reference(x_nchw, w1, b1, w2, b2):
    """Pure-JAX f32 reference using lax conv (NCHW / OIHW, valid padding)."""
    def conv(x, w_hwio, b):
        w_oihw = jnp.transpose(w_hwio, (3, 2, 0, 1))
        y = lax.conv_general_dilated(
            x, w_oihw, window_strides=(1, 1), padding="VALID",
            dimension_numbers=("NCHW", "OIHW", "NCHW"))
        return y + b.reshape(1, -1, 1, 1)
    h = jnp.maximum(conv(x_nchw, w1, b1), 0.0)
    return jnp.maximum(conv(h, w2, b2), 0.0)


if __name__ == "__main__":
    # Small shapes consistent with Block(inChannels=4, outChannels=8), 16x16 input.
    N, Cin, Cout, H, W = 2, 4, 8, 16, 16

    key = jax.random.PRNGKey(0)
    k_x, k_w1, k_b1, k_w2, k_b2 = jax.random.split(key, 5)

    x = jax.random.normal(k_x, (N, Cin, H, W), jnp.float32)
    # HWIO weights (PyTorch Conv2d OIHW permuted), deterministic init.
    w1 = jax.random.normal(k_w1, (K, K, Cin, Cout), jnp.float32) * 0.1
    b1 = jax.random.normal(k_b1, (Cout,), jnp.float32) * 0.1
    w2 = jax.random.normal(k_w2, (K, K, Cout, Cout), jnp.float32) * 0.1
    b2 = jax.random.normal(k_b2, (Cout,), jnp.float32) * 0.1

    out = jax.block_until_ready(unet_block(x, w1, b1, w2, b2))
    ref = jax.block_until_ready(_reference(x, w1, b1, w2, b2))

    assert out.shape == (N, Cout, H - 4, W - 4), out.shape
    # bf16 MXU operands (f32 accumulate) vs. the pure-f32 reference: use a
    # bf16-appropriate tolerance (~2^-9 relative per operand, values O(1)).
    max_err = float(jnp.max(jnp.abs(out - ref)))
    assert jnp.allclose(out, ref, atol=5e-2, rtol=5e-2), max_err

    print("KERNEL_OK")
</pallas_src>

<mosaic_0001>
module attributes {stable_mosaic.version = 11 : i64} {
  func.func @_block_kernel(%arg0: i32, %arg1: memref<1x4x324xbf16, #tpu.memory_space<vmem>>, %arg2: memref<9x8x4xbf16, #tpu.memory_space<vmem>>, %arg3: memref<8x1xf32, #tpu.memory_space<vmem>>, %arg4: memref<9x8x8xbf16, #tpu.memory_space<vmem>>, %arg5: memref<8x1xf32, #tpu.memory_space<vmem>>, %arg6: memref<1x8x256xf32, #tpu.memory_space<vmem>>, %arg7: memref<8x290xbf16, #tpu.memory_space<vmem>>) attributes {dimension_semantics = [#tpu.dimension_semantics<parallel>], iteration_bounds = array<i64: 2>, scalar_prefetch = 0 : i64, scratch_operands = 1 : i64, tpu.core_type = #tpu.core_type<tc>, window_params = [{transform_indices = @transform_0, window_bounds = array<i64: 1, 4, 324>}, {pipeline_mode = #tpu.pipeline_mode<synchronous>, transform_indices = @transform_1, window_bounds = array<i64: 9, 8, 4>}, {pipeline_mode = #tpu.pipeline_mode<synchronous>, transform_indices = @transform_2, window_bounds = array<i64: 8, 1>}, {pipeline_mode = #tpu.pipeline_mode<synchronous>, transform_indices = @transform_3, window_bounds = array<i64: 9, 8, 8>}, {pipeline_mode = #tpu.pipeline_mode<synchronous>, transform_indices = @transform_4, window_bounds = array<i64: 8, 1>}, {transform_indices = @transform_5, window_bounds = array<i64: 1, 8, 256>}]} {
    %cst = arith.constant 0.000000e+00 : f32
    %0 = vector.broadcast %cst : f32 to vector<8x290xf32>
    %c0 = arith.constant 0 : index
    %c0_0 = arith.constant 0 : index
    %c0_1 = arith.constant 0 : index
    %1 = vector.load %arg1[%c0, %c0_0, %c0_1] : memref<1x4x324xbf16, #tpu.memory_space<vmem>>, vector<1x4x290xbf16>
    %2 = vector.shape_cast %1 : vector<1x4x290xbf16> to vector<4x290xbf16>
    %c0_2 = arith.constant 0 : index
    %c0_3 = arith.constant 0 : index
    %c0_4 = arith.constant 0 : index
    %3 = vector.load %arg2[%c0_2, %c0_3, %c0_4] : memref<9x8x4xbf16, #tpu.memory_space<vmem>>, vector<1x8x4xbf16>
    %4 = vector.shape_cast %3 : vector<1x8x4xbf16> to vector<8x4xbf16>
    %cst_5 = arith.constant dense<0.000000e+00> : vector<8x290xf32>
    %5 = tpu.matmul %4, %2, %cst_5 {dimension_numbers = #tpu.dot_dimension_numbers<[1], [0], [0], [1], [0, 0, 1, 1], [], []>} : vector<8x4xbf16>, vector<4x290xbf16>, vector<8x290xf32> -> vector<8x290xf32>
    %6 = arith.addf %0, %5 : vector<8x290xf32>
    %c0_6 = arith.constant 0 : index
    %c0_7 = arith.constant 0 : index
    %c1 = arith.constant 1 : index
    %7 = vector.load %arg1[%c0_6, %c0_7, %c1] : memref<1x4x324xbf16, #tpu.memory_space<vmem>>, vector<1x4x290xbf16>
    %8 = vector.shape_cast %7 : vector<1x4x290xbf16> to vector<4x290xbf16>
    %c1_8 = arith.constant 1 : index
    %c0_9 = arith.constant 0 : index
    %c0_10 = arith.constant 0 : index
    %9 = vector.load %arg2[%c1_8, %c0_9, %c0_10] : memref<9x8x4xbf16, #tpu.memory_space<vmem>>, vector<1x8x4xbf16>
    %10 = vector.shape_cast %9 : vector<1x8x4xbf16> to vector<8x4xbf16>
    %cst_11 = arith.constant dense<0.000000e+00> : vector<8x290xf32>
    %11 = tpu.matmul %10, %8, %cst_11 {dimension_numbers = #tpu.dot_dimension_numbers<[1], [0], [0], [1], [0, 0, 1, 1], [], []>} : vector<8x4xbf16>, vector<4x290xbf16>, vector<8x290xf32> -> vector<8x290xf32>
    %12 = arith.addf %6, %11 : vector<8x290xf32>
    %c0_12 = arith.constant 0 : index
    %c0_13 = arith.constant 0 : index
    %c2 = arith.constant 2 : index
    %13 = vector.load %arg1[%c0_12, %c0_13, %c2] : memref<1x4x324xbf16, #tpu.memory_space<vmem>>, vector<1x4x290xbf16>
    %14 = vector.shape_cast %13 : vector<1x4x290xbf16> to vector<4x290xbf16>
    %c2_14 = arith.constant 2 : index
    %c0_15 = arith.constant 0 : index
    %c0_16 = arith.constant 0 : index
    %15 = vector.load %arg2[%c2_14, %c0_15, %c0_16] : memref<9x8x4xbf16, #tpu.memory_space<vmem>>, vector<1x8x4xbf16>
    %16 = vector.shape_cast %15 : vector<1x8x4xbf16> to vector<8x4xbf16>
    %cst_17 = arith.constant dense<0.000000e+00> : vector<8x290xf32>
    %17 = tpu.matmul %16, %14, %cst_17 {dimension_numbers = #tpu.dot_dimension_numbers<[1], [0], [0], [1], [0, 0, 1, 1], [], []>} : vector<8x4xbf16>, vector<4x290xbf16>, vector<8x290xf32> -> vector<8x290xf32>
    %18 = arith.addf %12, %17 : vector<8x290xf32>
    %c0_18 = arith.constant 0 : index
    %c0_19 = arith.constant 0 : index
    %c16 = arith.constant 16 : index
    %19 = vector.load %arg1[%c0_18, %c0_19, %c16] : memref<1x4x324xbf16, #tpu.memory_space<vmem>>, vector<1x4x290xbf16>
    %20 = vector.shape_cast %19 : vector<1x4x290xbf16> to vector<4x290xbf16>
    %c3 = arith.constant 3 : index
    %c0_20 = arith.constant 0 : index
    %c0_21 = arith.constant 0 : index
    %21 = vector.load %arg2[%c3, %c0_20, %c0_21] : memref<9x8x4xbf16, #tpu.memory_space<vmem>>, vector<1x8x4xbf16>
    %22 = vector.shape_cast %21 : vector<1x8x4xbf16> to vector<8x4xbf16>
    %cst_22 = arith.constant dense<0.000000e+00> : vector<8x290xf32>
    %23 = tpu.matmul %22, %20, %cst_22 {dimension_numbers = #tpu.dot_dimension_numbers<[1], [0], [0], [1], [0, 0, 1, 1], [], []>} : vector<8x4xbf16>, vector<4x290xbf16>, vector<8x290xf32> -> vector<8x290xf32>
    %24 = arith.addf %18, %23 : vector<8x290xf32>
    %c0_23 = arith.constant 0 : index
    %c0_24 = arith.constant 0 : index
    %c17 = arith.constant 17 : index
    %25 = vector.load %arg1[%c0_23, %c0_24, %c17] : memref<1x4x324xbf16, #tpu.memory_space<vmem>>, vector<1x4x290xbf16>
    %26 = vector.shape_cast %25 : vector<1x4x290xbf16> to vector<4x290xbf16>
    %c4 = arith.constant 4 : index
    %c0_25 = arith.constant 0 : index
    %c0_26 = arith.constant 0 : index
    %27 = vector.load %arg2[%c4, %c0_25, %c0_26] : memref<9x8x4xbf16, #tpu.memory_space<vmem>>, vector<1x8x4xbf16>
    %28 = vector.shape_cast %27 : vector<1x8x4xbf16> to vector<8x4xbf16>
    %cst_27 = arith.constant dense<0.000000e+00> : vector<8x290xf32>
    %29 = tpu.matmul %28, %26, %cst_27 {dimension_numbers = #tpu.dot_dimension_numbers<[1], [0], [0], [1], [0, 0, 1, 1], [], []>} : vector<8x4xbf16>, vector<4x290xbf16>, vector<8x290xf32> -> vector<8x290xf32>
    %30 = arith.addf %24, %29 : vector<8x290xf32>
    %c0_28 = arith.constant 0 : index
    %c0_29 = arith.constant 0 : index
    %c18 = arith.constant 18 : index
    %31 = vector.load %arg1[%c0_28, %c0_29, %c18] : memref<1x4x324xbf16, #tpu.memory_space<vmem>>, vector<1x4x290xbf16>
    %32 = vector.shape_cast %31 : vector<1x4x290xbf16> to vector<4x290xbf16>
    %c5 = arith.constant 5 : index
    %c0_30 = arith.constant 0 : index
    %c0_31 = arith.constant 0 : index
    %33 = vector.load %arg2[%c5, %c0_30, %c0_31] : memref<9x8x4xbf16, #tpu.memory_space<vmem>>, vector<1x8x4xbf16>
    %34 = vector.shape_cast %33 : vector<1x8x4xbf16> to vector<8x4xbf16>
    %cst_32 = arith.constant dense<0.000000e+00> : vector<8x290xf32>
    %35 = tpu.matmul %34, %32, %cst_32 {dimension_numbers = #tpu.dot_dimension_numbers<[1], [0], [0], [1], [0, 0, 1, 1], [], []>} : vector<8x4xbf16>, vector<4x290xbf16>, vector<8x290xf32> -> vector<8x290xf32>
    %36 = arith.addf %30, %35 : vector<8x290xf32>
    %c0_33 = arith.constant 0 : index
    %c0_34 = arith.constant 0 : index
    %c32 = arith.constant 32 : index
    %37 = vector.load %arg1[%c0_33, %c0_34, %c32] : memref<1x4x324xbf16, #tpu.memory_space<vmem>>, vector<1x4x290xbf16>
    %38 = vector.shape_cast %37 : vector<1x4x290xbf16> to vector<4x290xbf16>
    %c6 = arith.constant 6 : index
    %c0_35 = arith.constant 0 : index
    %c0_36 = arith.constant 0 : index
    %39 = vector.load %arg2[%c6, %c0_35, %c0_36] : memref<9x8x4xbf16, #tpu.memory_space<vmem>>, vector<1x8x4xbf16>
    %40 = vector.shape_cast %39 : vector<1x8x4xbf16> to vector<8x4xbf16>
    %cst_37 = arith.constant dense<0.000000e+00> : vector<8x290xf32>
    %41 = tpu.matmul %40, %38, %cst_37 {dimension_numbers = #tpu.dot_dimension_numbers<[1], [0], [0], [1], [0, 0, 1, 1], [], []>} : vector<8x4xbf16>, vector<4x290xbf16>, vector<8x290xf32> -> vector<8x290xf32>
    %42 = arith.addf %36, %41 : vector<8x290xf32>
    %c0_38 = arith.constant 0 : index
    %c0_39 = arith.constant 0 : index
    %c33 = arith.constant 33 : index
    %43 = vector.load %arg1[%c0_38, %c0_39, %c33] : memref<1x4x324xbf16, #tpu.memory_space<vmem>>, vector<1x4x290xbf16>
    %44 = vector.shape_cast %43 : vector<1x4x290xbf16> to vector<4x290xbf16>
    %c7 = arith.constant 7 : index
    %c0_40 = arith.constant 0 : index
    %c0_41 = arith.constant 0 : index
    %45 = vector.load %arg2[%c7, %c0_40, %c0_41] : memref<9x8x4xbf16, #tpu.memory_space<vmem>>, vector<1x8x4xbf16>
    %46 = vector.shape_cast %45 : vector<1x8x4xbf16> to vector<8x4xbf16>
    %cst_42 = arith.constant dense<0.000000e+00> : vector<8x290xf32>
    %47 = tpu.matmul %46, %44, %cst_42 {dimension_numbers = #tpu.dot_dimension_numbers<[1], [0], [0], [1], [0, 0, 1, 1], [], []>} : vector<8x4xbf16>, vector<4x290xbf16>, vector<8x290xf32> -> vector<8x290xf32>
    %48 = arith.addf %42, %47 : vector<8x290xf32>
    %c0_43 = arith.constant 0 : index
    %c0_44 = arith.constant 0 : index
    %c34 = arith.constant 34 : index
    %49 = vector.load %arg1[%c0_43, %c0_44, %c34] : memref<1x4x324xbf16, #tpu.memory_space<vmem>>, vector<1x4x290xbf16>
    %50 = vector.shape_cast %49 : vector<1x4x290xbf16> to vector<4x290xbf16>
    %c8 = arith.constant 8 : index
    %c0_45 = arith.constant 0 : index
    %c0_46 = arith.constant 0 : index
    %51 = vector.load %arg2[%c8, %c0_45, %c0_46] : memref<9x8x4xbf16, #tpu.memory_space<vmem>>, vector<1x8x4xbf16>
    %52 = vector.shape_cast %51 : vector<1x8x4xbf16> to vector<8x4xbf16>
    %cst_47 = arith.constant dense<0.000000e+00> : vector<8x290xf32>
    %53 = tpu.matmul %52, %50, %cst_47 {dimension_numbers = #tpu.dot_dimension_numbers<[1], [0], [0], [1], [0, 0, 1, 1], [], []>} : vector<8x4xbf16>, vector<4x290xbf16>, vector<8x290xf32> -> vector<8x290xf32>
    %54 = arith.addf %48, %53 : vector<8x290xf32>
    %c0_48 = arith.constant 0 : index
    %c0_49 = arith.constant 0 : index
    %55 = vector.load %arg3[%c0_48, %c0_49] : memref<8x1xf32, #tpu.memory_space<vmem>>, vector<8x1xf32>
    %56 = vector.broadcast %55 : vector<8x1xf32> to vector<8x290xf32>
    %57 = arith.addf %54, %56 : vector<8x290xf32>
    %cst_50 = arith.constant 0.000000e+00 : f32
    %58 = vector.broadcast %cst_50 : f32 to vector<8x290xf32>
    %59 = arith.maximumf %57, %58 : vector<8x290xf32>
    %60 = arith.truncf %59 : vector<8x290xf32> to vector<8x290xbf16>
    %c0_51 = arith.constant 0 : index
    %c0_52 = arith.constant 0 : index
    %61 = vector.load %arg7[%c0_51, %c0_52] : memref<8x290xbf16, #tpu.memory_space<vmem>>, vector<8x290xbf16>
    tpu.vector_store %arg7[%c0_51, %c0_52], %60 {strides = array<i32>} : memref<8x290xbf16, #tpu.memory_space<vmem>>, vector<8x290xbf16>,
    %cst_53 = arith.constant 0.000000e+00 : f32
    %62 = vector.broadcast %cst_53 : f32 to vector<8x256xf32>
    %c0_54 = arith.constant 0 : index
    %c0_55 = arith.constant 0 : index
    %63 = vector.load %arg7[%c0_54, %c0_55] : memref<8x290xbf16, #tpu.memory_space<vmem>>, vector<8x256xbf16>
    %c0_56 = arith.constant 0 : index
    %c0_57 = arith.constant 0 : index
    %c0_58 = arith.constant 0 : index
    %64 = vector.load %arg4[%c0_56, %c0_57, %c0_58] : memref<9x8x8xbf16, #tpu.memory_space<vmem>>, vector<1x8x8xbf16>
    %65 = vector.shape_cast %64 : vector<1x8x8xbf16> to vector<8x8xbf16>
    %cst_59 = arith.constant dense<0.000000e+00> : vector<8x256xf32>
    %66 = tpu.matmul %65, %63, %cst_59 {dimension_numbers = #tpu.dot_dimension_numbers<[1], [0], [0], [1], [0, 0, 1, 1], [], []>} : vector<8x8xbf16>, vector<8x256xbf16>, vector<8x256xf32> -> vector<8x256xf32>
    %67 = arith.addf %62, %66 : vector<8x256xf32>
    %c0_60 = arith.constant 0 : index
    %c1_61 = arith.constant 1 : index
    %68 = vector.load %arg7[%c0_60, %c1_61] : memref<8x290xbf16, #tpu.memory_space<vmem>>, vector<8x256xbf16>
    %c1_62 = arith.constant 1 : index
    %c0_63 = arith.constant 0 : index
    %c0_64 = arith.constant 0 : index
    %69 = vector.load %arg4[%c1_62, %c0_63, %c0_64] : memref<9x8x8xbf16, #tpu.memory_space<vmem>>, vector<1x8x8xbf16>
    %70 = vector.shape_cast %69 : vector<1x8x8xbf16> to vector<8x8xbf16>
    %cst_65 = arith.constant dense<0.000000e+00> : vector<8x256xf32>
    %71 = tpu.matmul %70, %68, %cst_65 {dimension_numbers = #tpu.dot_dimension_numbers<[1], [0], [0], [1], [0, 0, 1, 1], [], []>} : vector<8x8xbf16>, vector<8x256xbf16>, vector<8x256xf32> -> vector<8x256xf32>
    %72 = arith.addf %67, %71 : vector<8x256xf32>
    %c0_66 = arith.constant 0 : index
    %c2_67 = arith.constant 2 : index
    %73 = vector.load %arg7[%c0_66, %c2_67] : memref<8x290xbf16, #tpu.memory_space<vmem>>, vector<8x256xbf16>
    %c2_68 = arith.constant 2 : index
    %c0_69 = arith.constant 0 : index
    %c0_70 = arith.constant 0 : index
    %74 = vector.load %arg4[%c2_68, %c0_69, %c0_70] : memref<9x8x8xbf16, #tpu.memory_space<vmem>>, vector<1x8x8xbf16>
    %75 = vector.shape_cast %74 : vector<1x8x8xbf16> to vector<8x8xbf16>
    %cst_71 = arith.constant dense<0.000000e+00> : vector<8x256xf32>
    %76 = tpu.matmul %75, %73, %cst_71 {dimension_numbers = #tpu.dot_dimension_numbers<[1], [0], [0], [1], [0, 0, 1, 1], [], []>} : vector<8x8xbf16>, vector<8x256xbf16>, vector<8x256xf32> -> vector<8x256xf32>
    %77 = arith.addf %72, %76 : vector<8x256xf32>
    %c0_72 = arith.constant 0 : index
    %c16_73 = arith.constant 16 : index
    %78 = vector.load %arg7[%c0_72, %c16_73] : memref<8x290xbf16, #tpu.memory_space<vmem>>, vector<8x256xbf16>
    %c3_74 = arith.constant 3 : index
    %c0_75 = arith.constant 0 : index
    %c0_76 = arith.constant 0 : index
    %79 = vector.load %arg4[%c3_74, %c0_75, %c0_76] : memref<9x8x8xbf16, #tpu.memory_space<vmem>>, vector<1x8x8xbf16>
    %80 = vector.shape_cast %79 : vector<1x8x8xbf16> to vector<8x8xbf16>
    %cst_77 = arith.constant dense<0.000000e+00> : vector<8x256xf32>
    %81 = tpu.matmul %80, %78, %cst_77 {dimension_numbers = #tpu.dot_dimension_numbers<[1], [0], [0], [1], [0, 0, 1, 1], [], []>} : vector<8x8xbf16>, vector<8x256xbf16>, vector<8x256xf32> -> vector<8x256xf32>
    %82 = arith.addf %77, %81 : vector<8x256xf32>
    %c0_78 = arith.constant 0 : index
    %c17_79 = arith.constant 17 : index
    %83 = vector.load %arg7[%c0_78, %c17_79] : memref<8x290xbf16, #tpu.memory_space<vmem>>, vector<8x256xbf16>
    %c4_80 = arith.constant 4 : index
    %c0_81 = arith.constant 0 : index
    %c0_82 = arith.constant 0 : index
    %84 = vector.load %arg4[%c4_80, %c0_81, %c0_82] : memref<9x8x8xbf16, #tpu.memory_space<vmem>>, vector<1x8x8xbf16>
    %85 = vector.shape_cast %84 : vector<1x8x8xbf16> to vector<8x8xbf16>
    %cst_83 = arith.constant dense<0.000000e+00> : vector<8x256xf32>
    %86 = tpu.matmul %85, %83, %cst_83 {dimension_numbers = #tpu.dot_dimension_numbers<[1], [0], [0], [1], [0, 0, 1, 1], [], []>} : vector<8x8xbf16>, vector<8x256xbf16>, vector<8x256xf32> -> vector<8x256xf32>
    %87 = arith.addf %82, %86 : vector<8x256xf32>
    %c0_84 = arith.constant 0 : index
    %c18_85 = arith.constant 18 : index
    %88 = vector.load %arg7[%c0_84, %c18_85] : memref<8x290xbf16, #tpu.memory_space<vmem>>, vector<8x256xbf16>
    %c5_86 = arith.constant 5 : index
    %c0_87 = arith.constant 0 : index
    %c0_88 = arith.constant 0 : index
    %89 = vector.load %arg4[%c5_86, %c0_87, %c0_88] : memref<9x8x8xbf16, #tpu.memory_space<vmem>>, vector<1x8x8xbf16>
    %90 = vector.shape_cast %89 : vector<1x8x8xbf16> to vector<8x8xbf16>
    %cst_89 = arith.constant dense<0.000000e+00> : vector<8x256xf32>
    %91 = tpu.matmul %90, %88, %cst_89 {dimension_numbers = #tpu.dot_dimension_numbers<[1], [0], [0], [1], [0, 0, 1, 1], [], []>} : vector<8x8xbf16>, vector<8x256xbf16>, vector<8x256xf32> -> vector<8x256xf32>
    %92 = arith.addf %87, %91 : vector<8x256xf32>
    %c0_90 = arith.constant 0 : index
    %c32_91 = arith.constant 32 : index
    %93 = vector.load %arg7[%c0_90, %c32_91] : memref<8x290xbf16, #tpu.memory_space<vmem>>, vector<8x256xbf16>
    %c6_92 = arith.constant 6 : index
    %c0_93 = arith.constant 0 : index
    %c0_94 = arith.constant 0 : index
    %94 = vector.load %arg4[%c6_92, %c0_93, %c0_94] : memref<9x8x8xbf16, #tpu.memory_space<vmem>>, vector<1x8x8xbf16>
    %95 = vector.shape_cast %94 : vector<1x8x8xbf16> to vector<8x8xbf16>
    %cst_95 = arith.constant dense<0.000000e+00> : vector<8x256xf32>
    %96 = tpu.matmul %95, %93, %cst_95 {dimension_numbers = #tpu.dot_dimension_numbers<[1], [0], [0], [1], [0, 0, 1, 1], [], []>} : vector<8x8xbf16>, vector<8x256xbf16>, vector<8x256xf32> -> vector<8x256xf32>
    %97 = arith.addf %92, %96 : vector<8x256xf32>
    %c0_96 = arith.constant 0 : index
    %c33_97 = arith.constant 33 : index
    %98 = vector.load %arg7[%c0_96, %c33_97] : memref<8x290xbf16, #tpu.memory_space<vmem>>, vector<8x256xbf16>
    %c7_98 = arith.constant 7 : index
    %c0_99 = arith.constant 0 : index
    %c0_100 = arith.constant 0 : index
    %99 = vector.load %arg4[%c7_98, %c0_99, %c0_100] : memref<9x8x8xbf16, #tpu.memory_space<vmem>>, vector<1x8x8xbf16>
    %100 = vector.shape_cast %99 : vector<1x8x8xbf16> to vector<8x8xbf16>
    %cst_101 = arith.constant dense<0.000000e+00> : vector<8x256xf32>
    %101 = tpu.matmul %100, %98, %cst_101 {dimension_numbers = #tpu.dot_dimension_numbers<[1], [0], [0], [1], [0, 0, 1, 1], [], []>} : vector<8x8xbf16>, vector<8x256xbf16>, vector<8x256xf32> -> vector<8x256xf32>
    %102 = arith.addf %97, %101 : vector<8x256xf32>
    %c0_102 = arith.constant 0 : index
    %c34_103 = arith.constant 34 : index
    %103 = vector.load %arg7[%c0_102, %c34_103] : memref<8x290xbf16, #tpu.memory_space<vmem>>, vector<8x256xbf16>
    %c8_104 = arith.constant 8 : index
    %c0_105 = arith.constant 0 : index
    %c0_106 = arith.constant 0 : index
    %104 = vector.load %arg4[%c8_104, %c0_105, %c0_106] : memref<9x8x8xbf16, #tpu.memory_space<vmem>>, vector<1x8x8xbf16>
    %105 = vector.shape_cast %104 : vector<1x8x8xbf16> to vector<8x8xbf16>
    %cst_107 = arith.constant dense<0.000000e+00> : vector<8x256xf32>
    %106 = tpu.matmul %105, %103, %cst_107 {dimension_numbers = #tpu.dot_dimension_numbers<[1], [0], [0], [1], [0, 0, 1, 1], [], []>} : vector<8x8xbf16>, vector<8x256xbf16>, vector<8x256xf32> -> vector<8x256xf32>
    %107 = arith.addf %102, %106 : vector<8x256xf32>
    %c0_108 = arith.constant 0 : index
    %c0_109 = arith.constant 0 : index
    %108 = vector.load %arg5[%c0_108, %c0_109] : memref<8x1xf32, #tpu.memory_space<vmem>>, vector<8x1xf32>
    %109 = vector.broadcast %108 : vector<8x1xf32> to vector<8x256xf32>
    %110 = arith.addf %107, %109 : vector<8x256xf32>
    %cst_110 = arith.constant 0.000000e+00 : f32
    %111 = vector.broadcast %cst_110 : f32 to vector<8x256xf32>
    %112 = arith.maximumf %110, %111 : vector<8x256xf32>
    %c0_111 = arith.constant 0 : index
    %c0_112 = arith.constant 0 : index
    %c0_113 = arith.constant 0 : index
    %113 = vector.load %arg6[%c0_111, %c0_112, %c0_113] : memref<1x8x256xf32, #tpu.memory_space<vmem>>, vector<1x8x256xf32>
    %114 = vector.shape_cast %113 : vector<1x8x256xf32> to vector<8x256xf32>
    %115 = vector.shape_cast %112 : vector<8x256xf32> to vector<1x8x256xf32>
    tpu.vector_store %arg6[%c0_111, %c0_112, %c0_113], %115 {strides = array<i32>} : memref<1x8x256xf32, #tpu.memory_space<vmem>>, vector<1x8x256xf32>,
    return
  }
  func.func @transform_0(%arg0: i32) -> (i32, i32, i32) {
    %c0_i32 = arith.constant 0 : i32
    %c0_i32_0 = arith.constant 0 : i32
    %c0_i32_1 = arith.constant 0 : i32
    return %arg0, %c0_i32, %c0_i32_0 : i32, i32, i32
  }
  func.func @transform_1(%arg0: i32) -> (i32, i32, i32) {
    %c0_i32 = arith.constant 0 : i32
    %c0_i32_0 = arith.constant 0 : i32
    %c0_i32_1 = arith.constant 0 : i32
    %c0_i32_2 = arith.constant 0 : i32
    return %c0_i32, %c0_i32_0, %c0_i32_1 : i32, i32, i32
  }
  func.func @transform_2(%arg0: i32) -> (i32, i32) {
    %c0_i32 = arith.constant 0 : i32
    %c0_i32_0 = arith.constant 0 : i32
    %c0_i32_1 = arith.constant 0 : i32
    return %c0_i32, %c0_i32_0 : i32, i32
  }
  func.func @transform_3(%arg0: i32) -> (i32, i32, i32) {
    %c0_i32 = arith.constant 0 : i32
    %c0_i32_0 = arith.constant 0 : i32
    %c0_i32_1 = arith.constant 0 : i32
    %c0_i32_2 = arith.constant 0 : i32
    return %c0_i32, %c0_i32_0, %c0_i32_1 : i32, i32, i32
  }
  func.func @transform_4(%arg0: i32) -> (i32, i32) {
    %c0_i32 = arith.constant 0 : i32
    %c0_i32_0 = arith.constant 0 : i32
    %c0_i32_1 = arith.constant 0 : i32
    return %c0_i32, %c0_i32_0 : i32, i32
  }
  func.func @transform_5(%arg0: i32) -> (i32, i32, i32) {
    %c0_i32 = arith.constant 0 : i32
    %c0_i32_0 = arith.constant 0 : i32
    %c0_i32_1 = arith.constant 0 : i32
    return %arg0, %c0_i32, %c0_i32_0 : i32, i32, i32
  }
}

</mosaic_0001>

<bundles_post_ra>
// kernel: tpu_custom_call.1
= control target key start
LH: loop header
LB: loop body
LE: loop exit
PB: predicated region body
PF: predicated region fallthrough
CT: control target
= control target key end

     0   :  { %10 = vsyncpa [#allocation4], 0  ;;  %s2696_s0 = inlined_call_operand.vmem [shape: bf16[2,4,324], index: 0, kind: input, shape index: {}]   ;;  %s2697_s1 = inlined_call_operand.vmem [shape: bf16[9,8,4], index: 1, kind: input, shape index: {}]   ;;  %s2698_s2 = inlined_call_operand.vmem [shape: f32[8,1], index: 2, kind: input, shape index: {}]   ;;  %s2699_s3 = inlined_call_operand.vmem [shape: bf16[9,8,8], index: 3, kind: input, shape index: {}]   ;;  %s2700_s4 = inlined_call_operand.vmem [shape: f32[8,1], index: 4, kind: input, shape index: {}]   ;;  %s2701_s5 = inlined_call_operand.hbm [shape: f32[2,8,256], index: 5, kind: output, shape index: {}]  }
   0x1   :  { %12 = vsyncpa [#allocation4 + $0x1], 0  ;;  %s2309_s18 = smov 0   ;;  %s2311_s19 = smov 0  }
   0x2   :  { %s2313_s20 = smov 0   ;;  %s2315_s21 = smov 0  }
   0x3 LB: > { %s2330_s22 = sadd.s32 4294967295, %s2264_s21   ;;  %s1988_s23 = sadd.s32 4294967294, %s2264_s21   ;;  %s2264_s21 = sphi %s2315_s21, %s2707_s21   ;;  %s2260_s20 = sphi %s2313_s20, %s2706_s20   ;;  %s2256_s19 = sphi %s2311_s19, %s2705_s19   ;;  %s2252_s18 = sphi %s2309_s18, %s2704_s18  }
   0x4   : > { %s2334_s24 = sadd.s32 1, %s2264_s21   ;;  %s135_s25 = sadd.s32 1, %s2260_s20 }
   0x5   : > { %s132_s26 = ssub.s32 %s2264_s21, %s2334_s24  ;;  %p145_p0 = scmp.ne.s32.totalorder %s2260_s20, %s2256_s19 }
   0x6   : > { %p133_p1 = scmp.eq.s32.totalorder %s132_s26, 0  ;;  %p146_p2 = scmp.eq.s32.totalorder %s2330_s22, 1 }
   0x7   : > { %p151_p3 = scmp.ne.s32.totalorder %s2256_s19, %s2252_s18  ;;  %p152_p4 = scmp.eq.s32.totalorder %s1988_s23, 1 }
   0x8   : > { %s2345_s27 = scalar_select %p133_p1, %s2260_s20, %s135_s25  }
   0x9   : > { %p2347_p5 = por %p146_p2, %p145_p0  ;;  %p2351_p6 = por %p152_p4, %p151_p3 }
   0xa   : > { %p1991_p7 = scmp.ge.s32.totalorder %s2264_s21, 1  ;;  %p190_p8 = scmp.lt.s32.totalorder %s2264_s21, 3 }
   0xc   : > { %p191_p9 = pnand %p1991_p7, %p190_p8 }
   0xd   : > { %p218_p10 = scmp.lt.s32.totalorder (!%p191_p9), %s2330_s22, 1  ;;  %s2270_s10 = smov (!%p191_p9), 127  }
   0xe   : > { %194 = sbr.rel (%p191_p9) target bundleno = 803 (0x323), region = 40  ;;  %s2271_s11 = smov (!%p191_p9), 126  }
   0xf   : > { %s2272_s12 = smov (!%p191_p9), 112   ;;  %s2273_s13 = smov (!%p191_p9), 111  }
  0x10   : > { %s2274_s14 = smov (!%p191_p9), 110   ;;  %s2275_s15 = smov (!%p191_p9), 96  }
  0x11   : > { %s2276_s16 = smov (!%p191_p9), 95   ;;  %s2277_s17 = smov (!%p191_p9), 94  }
  0x13   : > { %v233_v0 = vlaneseq  ;;  %v2266_v1 = vmov 1983009808   ;;  %v2267_v3 = vmov 0.0   ;;  %s219_s30 = scalar_select %p218_p10, %s2330_s22, 1  ;;  %vm2268_vm0 = vmmov 0   ;;  %v1317_v48 = vld [vmem:[%s2698_s2] sm:$0xff] }
  0x14   : > { %v231_v2 = vunpack.c.l.s4 %v2266_v1  ;;  %2086 = vmatprep.subr.bf16.mxu1 %v2267_v3  ;;  %2088 = vmatprep.mubr.msk.bf16.mxu1 %vm2268_vm0, %v2267_v3  ;;  %v2269_v6 = vmov 0   ;;  %vm258_vm1 = vcmask 1041408   ;;  %vm251_vm2 = vcmask 1039360   ;;  %v1994_v53 = vld [vmem:[%s2697_s1 + $0x4] sm:$0xf] }
  0x15   : > { %v234_v4 = vshrl.u32 %v233_v0, 7  ;;  %s2140_s6 = smul.u32 6, %s219_s30  ;;  %300 = vmatprep.mubr.bf16.mxu0 %v2269_v6  ;;  %2192 = vset.pattern.permute.xlu0 %v2269_v6  ;;  %vm254_vm3 = vcmask 31744   ;;  %vm468_vm4 = vcmask 1031168   ;;  %v225_v63 = vld [vmem:[%s2697_s1] sm:$0xf] }
  0x16   : > { %v232_v5 = vunpack.c.0.s8 %v231_v2  ;;  %vm593_vm5 = vcmask 916480   ;;  %vm718_vm6 = vcmask 908288   ;;  %vm843_vm7 = vcmask 900096  }
  0x17   : > { %s2369_s9 = scalar_lea.vmem %s2696_s0, %s2140_s6  ;;  %vm968_vm8 = vcmask 785408   ;;  %vm1093_vm9 = vcmask 777216   ;;  %vm1218_vm10 = vcmask 769024   ;;  %vm1343_vm11 = vcmask 273408  }
  0x18   : > { %v2364_v7 = vsub.s32 %v232_v5, %v234_v4  ;;  %v224_v8 = vld [vmem:[%s2369_s9] sm:$0x3f]  ;;  %vm1370_vm12 = vcmask 1043456   ;;  %vm1366_vm13 = vcmask 64512  }
  0x19   : > { %v442_v9 = vld [vmem:[%s2369_s9] sm:$0x3f]  ;;  %v229_v11 = vcombine.high %v224_v8, %v224_v8 }
  0x1a   : > { %v2374_v10 = vrot.slane %v224_v8, %v2364_v7  ;;  %v453_v14 = vrot.slane %v442_v9, %v2364_v7  ;;  %v446_v15 = vcombine.high %v442_v9, %v442_v9  ;;  %v567_v16 = vld [vmem:[%s2369_s9] sm:$0x3f] }
  0x1b   : > { %v2379_v12 = vrot.slane %v229_v11, %v2364_v7  ;;  %v578_v19 = vrot.slane %v567_v16, %v2364_v7  ;;  %v571_v20 = vcombine.high %v567_v16, %v567_v16  ;;  %v692_v21 = vld [vmem:[%s2369_s9] sm:$0x3f] }
  0x1c   : > { %245 = vrot.lane.b32.xlu0 %v2374_v10, %s2270_s10  ;;  %v2383_v13 = vcombine.high %v2374_v10, %v2374_v10  ;;  %v461_v17 = vcombine.high %v453_v14, %v453_v14  ;;  %v460_v18 = vrot.slane %v446_v15, %v2364_v7  ;;  %v703_v24 = vrot.slane %v692_v21, %v2364_v7  ;;  %v817_v26 = vld [vmem:[%s2369_s9] sm:$0x3f] }
  0x1d   : > { %249 = vrot.lane.b32.xlu1 %v2379_v12, %s2270_s10  ;;  %v586_v22 = vcombine.high %v578_v19, %v578_v19  ;;  %v585_v23 = vrot.slane %v571_v20, %v2364_v7  ;;  %v696_v25 = vcombine.high %v692_v21, %v692_v21  ;;  %v828_v29 = vrot.slane %v817_v26, %v2364_v7  ;;  %v942_v31 = vld [vmem:[%s2369_s9] sm:$0x3f] }
  0x1e   : > { %v711_v27 = vcombine.high %v703_v24, %v703_v24  ;;  %v821_v30 = vcombine.high %v817_v26, %v817_v26  ;;  %v953_v34 = vrot.slane %v942_v31, %v2364_v7  ;;  %v946_v35 = vcombine.high %v942_v31, %v942_v31  ;;  %v1067_v36 = vld [vmem:[%s2369_s9] sm:$0x3f] }
  0x1f   : > { %v710_v28 = vrot.slane %v696_v25, %v2364_v7  ;;  %v836_v32 = vcombine.high %v828_v29, %v828_v29  ;;  %v1078_v39 = vrot.slane %v1067_v36, %v2364_v7  ;;  %v1071_v40 = vcombine.high %v1067_v36, %v1067_v36  ;;  %v1192_v41 = vld [vmem:[%s2369_s9] sm:$0x3f] }
  0x20   : > { %247 = vrot.lane.b32.xlu0 %v2383_v13, %s2270_s10  ;;  %v835_v33 = vrot.slane %v821_v30, %v2364_v7  ;;  %v961_v37 = vcombine.high %v953_v34, %v953_v34  ;;  %v960_v38 = vrot.slane %v946_v35, %v2364_v7  ;;  %v1203_v44 = vrot.slane %v1192_v41, %v2364_v7  ;;  %v2013_v35 = vld [vmem:[%s2697_s1 + $0x14] sm:$0xf] }
  0x21   : > { %462 = vrot.lane.b32.xlu1 %v453_v14, %s2271_s11  ;;  %v1086_v42 = vcombine.high %v1078_v39, %v1078_v39  ;;  %v1085_v43 = vrot.slane %v1071_v40, %v2364_v7  ;;  %v1196_v45 = vcombine.high %v1192_v41, %v1192_v41  ;;  %v359_v56 = vsel %vm258_vm1, %v2379_v12, 0 }
  0x22   : > { %v1211_v46 = vcombine.high %v1203_v44, %v1203_v44  ;;  %v353_v60 = vsel %vm258_vm1, %v2374_v10, 0  ;;  %v2001_v10 = vld [vmem:[%s2697_s1 + $0x8] sm:$0xf] }
  0x23   : > { %v1210_v47 = vrot.slane %v1196_v45, %v2364_v7 }
  0x24   : > { %464 = vrot.lane.b32.xlu0 %v461_v17, %s2271_s11 }
  0x25   : > { %466 = vrot.lane.b32.xlu1 %v460_v18, %s2271_s11 }
  0x28   : > { %587 = vrot.lane.b32.xlu0 %v578_v19, %s2272_s12  ;;  %v2005_v19 = vld [vmem:[%s2697_s1 + $0xc] sm:$0xf] }
  0x29   : > { %589 = vrot.lane.b32.xlu1 %v586_v22, %s2272_s12 }
  0x2c   : > { %591 = vrot.lane.b32.xlu0 %v585_v23, %s2272_s12 }
  0x2d   : > { %712 = vrot.lane.b32.xlu1 %v703_v24, %s2273_s13 }
  0x30   : > { %714 = vrot.lane.b32.xlu0 %v711_v27, %s2273_s13  ;;  %v2009_v27 = vld [vmem:[%s2697_s1 + $0x10] sm:$0xf] }
  0x31   : > { %716 = vrot.lane.b32.xlu1 %v710_v28, %s2273_s13 }
  0x34   : > { %837 = vrot.lane.b32.xlu0 %v828_v29, %s2274_s14 }
  0x35   : > { %839 = vrot.lane.b32.xlu1 %v836_v32, %s2274_s14 }
  0x38   : > { %841 = vrot.lane.b32.xlu0 %v835_v33, %s2274_s14 }
  0x39   : > { %962 = vrot.lane.b32.xlu1 %v953_v34, %s2275_s15 }
  0x3c   : > { %964 = vrot.lane.b32.xlu0 %v961_v37, %s2275_s15 }
  0x3d   : > { %966 = vrot.lane.b32.xlu1 %v960_v38, %s2275_s15 }
  0x40   : > { %1087 = vrot.lane.b32.xlu0 %v1078_v39, %s2276_s16 }
  0x41   : > { %1089 = vrot.lane.b32.xlu1 %v1086_v42, %s2276_s16  ;;  %v2017_v42 = vld [vmem:[%s2697_s1 + $0x18] sm:$0xf] }
  0x44   : > { %1091 = vrot.lane.b32.xlu0 %v1085_v43, %s2276_s16 }
  0x45   : > { %1212 = vrot.lane.b32.xlu1 %v1203_v44, %s2277_s17 }
  0x48   : > { %1214 = vrot.lane.b32.xlu0 %v1211_v46, %s2277_s17 }
  0x49   : > { %1216 = vrot.lane.b32.xlu1 %v1210_v47, %s2277_s17 }
  0x4c   : > { %1320 = vperm.xlu0 %2192, %v1317_v48  }
  0x8e   : > { %v246_v49 = vpop.permute.xlu0 %245 }
  0x8f   : > { %v250_v50 = vpop.permute.xlu1 %249 }
  0x90   : > { %v266_v51 = vsel %vm258_vm1, %v250_v50, 0 }
  0x91   : > { %2087 = vmatpush3.bf16.msra.mxu1 %v266_v51 }
  0x92   : > { %v248_v52 = vpop.permute.xlu0 %247  ;;  %2092 = vmatprep.subr.bf16.mxu1 %v2267_v3 }
  0x93   : > { %v253_v54 = vsel %vm251_vm2, %v248_v52, %v250_v50  ;;  %v252_v55 = vsel %vm251_vm2, %v246_v49, %v248_v52  ;;  %v463_v58 = vpop.permute.xlu1 %462  ;;  %v2021_v49 = vld [vmem:[%s2697_s1 + $0x1c] sm:$0xf] }
  0x94   : > { %1995 = vmatprep.subr.msk.bf16.mxu0 %vm258_vm1, %v253_v54  ;;  %v260_v57 = vsel %vm258_vm1, %v252_v55, 0  ;;  %2089 = vmatmul.mubr.msk.bf16.vlgmr.msra.gmra.mxu1 %vm254_vm3, %v1994_v53 }
  0x95   : > { %283 = vmatpush1.bf16.msra.mxu0 %v260_v57  ;;  %2093 = vmatpush3.bf16.msra.mxu1 %v359_v56 }
  0x96   : > { %1998 = vmatprep.subr.msk.bf16.mxu0 %vm258_vm1, %v2383_v13  ;;  %v465_v59 = vpop.permute.xlu0 %464  ;;  %2094 = vmatprep.mubr.msk.bf16.mxu1 %vm2268_vm0, %v2267_v3 }
  0x97   : > { %2098 = vmatprep.subr.bf16.mxu1 %v2267_v3  ;;  %v467_v61 = vpop.permute.xlu1 %466  ;;  %v469_v1 = vsel %vm468_vm4, %v463_v58, %v465_v59 }
  0x98   : > { %1996 = vmatmul.mubr.msk.bf16.vlgmr.msra.gmra.mxu0 %vm254_vm3, %v1994_v53  ;;  %v470_v62 = vsel %vm468_vm4, %v465_v59, %v467_v61  ;;  %v481_v2 = vsel %vm258_vm1, %v467_v61, 0  ;;  %v475_v5 = vsel %vm258_vm1, %v469_v1, 0  ;;  %v2025_v53 = vld [vmem:[%s2697_s1 + $0x20] sm:$0xf] }
  0x99   : > { %376 = vmatpush1.bf16.msra.mxu0 %v353_v60  ;;  %393 = vmatprep.mubr.bf16.mxu0 %v2269_v6 }
  0x9a   : > { %2002 = vmatprep.subr.msk.bf16.mxu0 %vm258_vm1, %v470_v62  ;;  %v588_v0 = vpop.permute.xlu0 %587 }
  0x9b   : > { %v590_v4 = vpop.permute.xlu1 %589 }
  0x9c   : > { %2095 = vmatmul.mubr.msk.bf16.vlgmr.msra.gmra.mxu1 %vm254_vm3, %v225_v63  ;;  %v594_v12 = vsel %vm593_vm5, %v588_v0, %v590_v4 }
  0x9d   : > { %2099 = vmatpush3.bf16.msra.mxu1 %v481_v2  ;;  %2100 = vmatprep.mubr.msk.bf16.mxu1 %vm2268_vm0, %v2267_v3  ;;  %v600_v15 = vsel %vm258_vm1, %v594_v12, 0 }
  0x9e   : > { %v592_v7 = vpop.permute.xlu0 %591  ;;  %2104 = vmatprep.subr.bf16.mxu1 %v2267_v3 }
  0x9f   : > { %v595_v8 = vsel %vm593_vm5, %v590_v4, %v592_v7  ;;  %v713_v9 = vpop.permute.xlu1 %712  ;;  %v606_v13 = vsel %vm258_vm1, %v592_v7, 0 }
  0xa0   : > { %1999 = vmatmul.mubr.msk.bf16.vlgmr.msra.gmra.mxu0 %vm254_vm3, %v225_v63 }
  0xa1   : > { %498 = vmatpush1.bf16.msra.mxu0 %v475_v5  ;;  %515 = vmatprep.mubr.bf16.mxu0 %v2269_v6 }
  0xa2   : > { %2006 = vmatprep.subr.msk.bf16.mxu0 %vm258_vm1, %v595_v8  ;;  %v715_v11 = vpop.permute.xlu0 %714 }
  0xa3   : > { %v717_v14 = vpop.permute.xlu1 %716  ;;  %v719_v20 = vsel %vm718_vm6, %v713_v9, %v715_v11 }
  0xa4   : > { %2101 = vmatmul.mubr.msk.bf16.vlgmr.msra.gmra.mxu1 %vm254_vm3, %v2001_v10  ;;  %v720_v17 = vsel %vm718_vm6, %v715_v11, %v717_v14  ;;  %v731_v21 = vsel %vm258_vm1, %v717_v14, 0  ;;  %v725_v23 = vsel %vm258_vm1, %v719_v20, 0 }
  0xa5   : > { %2105 = vmatpush3.bf16.msra.mxu1 %v606_v13  ;;  %2106 = vmatprep.mubr.msk.bf16.mxu1 %vm2268_vm0, %v2267_v3 }
  0xa6   : > { %v838_v16 = vpop.permute.xlu0 %837  ;;  %2110 = vmatprep.subr.bf16.mxu1 %v2267_v3 }
  0xa7   : > { %v840_v18 = vpop.permute.xlu1 %839 }
  0xa8   : > { %2003 = vmatmul.mubr.msk.bf16.vlgmr.msra.gmra.mxu0 %vm254_vm3, %v2001_v10  ;;  %v844_v28 = vsel %vm843_vm7, %v838_v16, %v840_v18 }
  0xa9   : > { %623 = vmatpush1.bf16.msra.mxu0 %v600_v15  ;;  %640 = vmatprep.mubr.bf16.mxu0 %v2269_v6  ;;  %v850_v31 = vsel %vm258_vm1, %v844_v28, 0 }
  0xaa   : > { %2010 = vmatprep.subr.msk.bf16.mxu0 %vm258_vm1, %v720_v17  ;;  %v842_v22 = vpop.permute.xlu0 %841 }
  0xab   : > { %v963_v24 = vpop.permute.xlu1 %962  ;;  %v845_v25 = vsel %vm843_vm7, %v840_v18, %v842_v22  ;;  %v856_v29 = vsel %vm258_vm1, %v842_v22, 0 }
  0xac   : > { %2107 = vmatmul.mubr.msk.bf16.vlgmr.msra.gmra.mxu1 %vm254_vm3, %v2005_v19 }
  0xad   : > { %2111 = vmatpush3.bf16.msra.mxu1 %v731_v21  ;;  %2112 = vmatprep.mubr.msk.bf16.mxu1 %vm2268_vm0, %v2267_v3 }
  0xae   : > { %2116 = vmatprep.subr.bf16.mxu1 %v2267_v3  ;;  %v965_v26 = vpop.permute.xlu0 %964 }
  0xaf   : > { %v967_v30 = vpop.permute.xlu1 %966  ;;  %v969_v36 = vsel %vm968_vm8, %v963_v24, %v965_v26 }
  0xb0   : > { %2007 = vmatmul.mubr.msk.bf16.vlgmr.msra.gmra.mxu0 %vm254_vm3, %v2005_v19  ;;  %v970_v33 = vsel %vm968_vm8, %v965_v26, %v967_v30  ;;  %v981_v37 = vsel %vm258_vm1, %v967_v30, 0  ;;  %v975_v39 = vsel %vm258_vm1, %v969_v36, 0 }
  0xb1   : > { %748 = vmatpush1.bf16.msra.mxu0 %v725_v23  ;;  %765 = vmatprep.mubr.bf16.mxu0 %v2269_v6 }
  0xb2   : > { %2014 = vmatprep.subr.msk.bf16.mxu0 %vm258_vm1, %v845_v25  ;;  %v1088_v32 = vpop.permute.xlu0 %1087 }
  0xb3   : > { %v1090_v34 = vpop.permute.xlu1 %1089 }
  0xb4   : > { %2113 = vmatmul.mubr.msk.bf16.vlgmr.msra.gmra.mxu1 %vm254_vm3, %v2009_v27  ;;  %v1094_v43 = vsel %vm1093_vm9, %v1088_v32, %v1090_v34 }
  0xb5   : > { %2117 = vmatpush3.bf16.msra.mxu1 %v856_v29  ;;  %2118 = vmatprep.mubr.msk.bf16.mxu1 %vm2268_vm0, %v2267_v3  ;;  %v1100_v47 = vsel %vm258_vm1, %v1094_v43, 0 }
  0xb6   : > { %2122 = vmatprep.subr.bf16.mxu1 %v2267_v3  ;;  %v1092_v38 = vpop.permute.xlu0 %1091 }
  0xb7   : > { %v1213_v40 = vpop.permute.xlu1 %1212  ;;  %v1095_v41 = vsel %vm1093_vm9, %v1090_v34, %v1092_v38  ;;  %v1106_v44 = vsel %vm258_vm1, %v1092_v38, 0 }
  0xb8   : > { %2011 = vmatmul.mubr.msk.bf16.vlgmr.msra.gmra.mxu0 %vm254_vm3, %v2009_v27 }
  0xb9   : > { %873 = vmatpush1.bf16.msra.mxu0 %v850_v31  ;;  %890 = vmatprep.mubr.bf16.mxu0 %v2269_v6 }
  0xba   : > { %2018 = vmatprep.subr.msk.bf16.mxu0 %vm258_vm1, %v970_v33  ;;  %v1215_v45 = vpop.permute.xlu0 %1214 }
  0xbb   : > { %v1217_v46 = vpop.permute.xlu1 %1216  ;;  %v1219_v50 = vsel %vm1218_vm10, %v1213_v40, %v1215_v45 }
  0xbc   : > { %2119 = vmatmul.mubr.msk.bf16.vlgmr.msra.gmra.mxu1 %vm254_vm3, %v2013_v35  ;;  %v1220_v48 = vsel %vm1218_vm10, %v1215_v45, %v1217_v46  ;;  %v1231_v51 = vsel %vm258_vm1, %v1217_v46, 0  ;;  %v1225_v52 = vsel %vm258_vm1, %v1219_v50, 0 }
  0xbd   : > { %2123 = vmatpush3.bf16.msra.mxu1 %v981_v37  ;;  %2124 = vmatprep.mubr.msk.bf16.mxu1 %vm2268_vm0, %v2267_v3 }
  0xbe   : > { %2128 = vmatprep.subr.bf16.mxu1 %v2267_v3 }
  0xc0   : > { %2015 = vmatmul.mubr.msk.bf16.vlgmr.msra.gmra.mxu0 %vm254_vm3, %v2013_v35 }
  0xc1   : > { %998 = vmatpush1.bf16.msra.mxu0 %v975_v39  ;;  %1015 = vmatprep.mubr.bf16.mxu0 %v2269_v6 }
  0xc2   : > { %2022 = vmatprep.subr.msk.bf16.mxu0 %vm258_vm1, %v1095_v41 }
  0xc4   : > { %2125 = vmatmul.mubr.msk.bf16.vlgmr.msra.gmra.mxu1 %vm254_vm3, %v2017_v42 }
  0xc5   : > { %2129 = vmatpush3.bf16.msra.mxu1 %v1106_v44  ;;  %2130 = vmatprep.mubr.msk.bf16.mxu1 %vm2268_vm0, %v2267_v3 }
  0xc6   : > { %2134 = vmatprep.subr.bf16.mxu1 %v2267_v3 }
  0xc8   : > { %2019 = vmatmul.mubr.msk.bf16.vlgmr.msra.gmra.mxu0 %vm254_vm3, %v2017_v42 }
  0xc9   : > { %1123 = vmatpush1.bf16.msra.mxu0 %v1100_v47  ;;  %1140 = vmatprep.mubr.bf16.mxu0 %v2269_v6 }
  0xca   : > { %2026 = vmatprep.subr.msk.bf16.mxu0 %vm258_vm1, %v1220_v48 }
  0xcc   : > { %2131 = vmatmul.mubr.msk.bf16.vlgmr.msra.gmra.mxu1 %vm254_vm3, %v2021_v49 }
  0xcd   : > { %2135 = vmatpush3.bf16.msra.mxu1 %v1231_v51  ;;  %2136 = vmatprep.mubr.msk.bf16.mxu1 %vm2268_vm0, %v2267_v3 }
  0xd0   : > { %2023 = vmatmul.mubr.msk.bf16.vlgmr.msra.gmra.mxu0 %vm254_vm3, %v2021_v49 }
  0xd1   : > { %1248 = vmatpush1.bf16.msra.mxu0 %v1225_v52  ;;  %1265 = vmatprep.mubr.bf16.mxu0 %v2269_v6 }
  0xd4   : > { %2137 = vmatmul.mubr.msk.bf16.vlgmr.msra.gmra.mxu1 %vm254_vm3, %v2025_v53 }
  0xd5   : > { %1459 = vmatprep.mubr.bf16.mxu1 %v2269_v6 }
  0xd8   : > { %2027 = vmatmul.mubr.msk.bf16.vlgmr.msra.gmra.mxu0 %vm254_vm3, %v2025_v53 }
  0xd9   : > { %1409 = vmatprep.mubr.bf16.mxu0 %v2269_v6 }
 0x154   : > { %v343_v54 = vpop.f32.mrf.mxu1 }
 0x156   : > { %v2090_v55 = vpop.f32.mrf.mxu1 }
 0x158   : > { %v302_v3 = vpop.f32.mrf.mxu0  ;;  %v346_v56 = vpop.f32.mrf.mxu1 }
 0x15a   : > { %v304_v57 = vpop.f32.mrf.mxu0  ;;  %v2091_v58 = vpop.f32.mrf.mxu1 }
 0x15c   : > { %v306_v59 = vpop.f32.mrf.mxu0  ;;  %v436_v60 = vpop.f32.mrf.mxu1 }
 0x15d   : > { %v437_v41 = vadd.f32 %v436_v60, %v343_v54 }
 0x15e   : > { %v307_v61 = vpop.f32.mrf.mxu0  ;;  %v2096_v62 = vpop.f32.mrf.mxu1 }
 0x160   : > { %v395_v63 = vpop.f32.mrf.mxu0  ;;  %v439_v0 = vpop.f32.mrf.mxu1 }
 0x161   : > { %v396_v43 = vadd.f32 %v395_v63, %v302_v3 }
 0x162   : > { %v397_v1 = vpop.f32.mrf.mxu0  ;;  %v2097_v2 = vpop.f32.mrf.mxu1 }
 0x163   : > { %v398_v50 = vadd.f32 %v397_v1, %v304_v57 }
 0x164   : > { %v399_v4 = vpop.f32.mrf.mxu0  ;;  %v558_v5 = vpop.f32.mrf.mxu1 }
 0x165   : > { %v566_v45 = vadd.f32 %v558_v5, %v437_v41 }
 0x166   : > { %v400_v7 = vpop.f32.mrf.mxu0  ;;  %v2102_v8 = vpop.f32.mrf.mxu1 }
 0x168   : > { %v517_v9 = vpop.f32.mrf.mxu0  ;;  %v561_v10 = vpop.f32.mrf.mxu1 }
 0x169   : > { %v564_v51 = vadd.f32 %v517_v9, %v396_v43  ;;  %v1321_v10 = vpop.permute.xlu0 %1320 }
 0x16a   : > { %v519_v11 = vpop.f32.mrf.mxu0  ;;  %v2103_v12 = vpop.f32.mrf.mxu1 }
 0x16b   : > { %v565_v56 = vadd.f32 %v519_v11, %v398_v50 }
 0x16c   : > { %v521_v13 = vpop.f32.mrf.mxu0  ;;  %v683_v14 = vpop.f32.mrf.mxu1 }
 0x16d   : > { %v691_v48 = vadd.f32 %v683_v14, %v566_v45 }
 0x16e   : > { %v522_v15 = vpop.f32.mrf.mxu0  ;;  %v2108_v16 = vpop.f32.mrf.mxu1 }
 0x170   : > { %v642_v17 = vpop.f32.mrf.mxu0  ;;  %v686_v18 = vpop.f32.mrf.mxu1 }
 0x171   : > { %v689_v58 = vadd.f32 %v642_v17, %v564_v51 }
 0x172   : > { %v644_v19 = vpop.f32.mrf.mxu0  ;;  %v2109_v20 = vpop.f32.mrf.mxu1 }
 0x173   : > { %v690_v0 = vadd.f32 %v644_v19, %v565_v56 }
 0x174   : > { %v646_v21 = vpop.f32.mrf.mxu0  ;;  %v808_v22 = vpop.f32.mrf.mxu1 }
 0x175   : > { %v816_v53 = vadd.f32 %v808_v22, %v691_v48 }
 0x176   : > { %v647_v23 = vpop.f32.mrf.mxu0  ;;  %v2114_v24 = vpop.f32.mrf.mxu1 }
 0x178   : > { %v767_v25 = vpop.f32.mrf.mxu0  ;;  %v811_v26 = vpop.f32.mrf.mxu1 }
 0x179   : > { %v814_v54 = vadd.f32 %v767_v25, %v689_v58 }
 0x17a   : > { %v769_v27 = vpop.f32.mrf.mxu0  ;;  %v2115_v28 = vpop.f32.mrf.mxu1 }
 0x17b   : > { %v815_v2 = vadd.f32 %v769_v27, %v690_v0 }
 0x17c   : > { %v771_v29 = vpop.f32.mrf.mxu0  ;;  %v933_v30 = vpop.f32.mrf.mxu1 }
 0x17d   : > { %v941_v61 = vadd.f32 %v933_v30, %v816_v53 }
 0x17e   : > { %v772_v31 = vpop.f32.mrf.mxu0  ;;  %v2120_v32 = vpop.f32.mrf.mxu1 }
 0x180   : > { %v892_v33 = vpop.f32.mrf.mxu0  ;;  %v936_v34 = vpop.f32.mrf.mxu1 }
 0x181   : > { %v939_v4 = vadd.f32 %v892_v33, %v814_v54 }
 0x182   : > { %v894_v35 = vpop.f32.mrf.mxu0  ;;  %v2121_v36 = vpop.f32.mrf.mxu1 }
 0x183   : > { %v940_v57 = vadd.f32 %v894_v35, %v815_v2  ;;  %v1346_v36 = vld [vmem:[%s2699_s3] sm:$0xf] }
 0x184   : > { %v896_v37 = vpop.f32.mrf.mxu0  ;;  %v1058_v38 = vpop.f32.mrf.mxu1 }
 0x185   : > { %v1066_v3 = vadd.f32 %v1058_v38, %v941_v61  ;;  %v1902_v37 = vld [vmem:[%s2700_s4] sm:$0xff] }
 0x186   : > { %v897_v39 = vpop.f32.mrf.mxu0  ;;  %v2126_v40 = vpop.f32.mrf.mxu1 }
 0x188   : > { %v1017_v42 = vpop.f32.mrf.mxu0  ;;  %v1061_v44 = vpop.f32.mrf.mxu1 }
 0x189   : > { %v1064_v1 = vadd.f32 %v1017_v42, %v939_v4 }
 0x18a   : > { %v1019_v46 = vpop.f32.mrf.mxu0  ;;  %v2127_v47 = vpop.f32.mrf.mxu1 }
 0x18b   : > { %v1065_v13 = vadd.f32 %v1019_v46, %v940_v57 }
 0x18c   : > { %v1021_v49 = vpop.f32.mrf.mxu0  ;;  %v1183_v52 = vpop.f32.mrf.mxu1 }
 0x18d   : > { %v1191_v7 = vadd.f32 %v1183_v52, %v1066_v3  ;;  %v2031_v52 = vld [vmem:[%s2699_s3 + $0x4] sm:$0xf]  ;;  %v2039_v3 = vld [vmem:[%s2699_s3 + $0x8] sm:$0xf] }
 0x18e   : > { %v1022_v55 = vpop.f32.mrf.mxu0  ;;  %v2132_v59 = vpop.f32.mrf.mxu1 }
 0x190   : > { %v1142_v62 = vpop.f32.mrf.mxu0  ;;  %v1186_v60 = vpop.f32.mrf.mxu1 }
 0x191   : > { %v1189_v14 = vadd.f32 %v1142_v62, %v1064_v1 }
 0x192   : > { %v1144_v63 = vpop.f32.mrf.mxu0  ;;  %v2133_v5 = vpop.f32.mrf.mxu1 }
 0x193   : > { %v1190_v18 = vadd.f32 %v1144_v63, %v1065_v13  ;;  %v2042_v63 = vld [vmem:[%s2699_s3 + $0xc] sm:$0xf]  ;;  %v2048_v13 = vld [vmem:[%s2699_s3 + $0x14] sm:$0xf] }
 0x194   : > { %v1146_v8 = vpop.f32.mrf.mxu0  ;;  %v1308_v9 = vpop.f32.mrf.mxu1 }
 0x195   : > { %v1316_v12 = vadd.f32 %v1308_v9, %v1191_v7 }
 0x196   : > { %v1147_v11 = vpop.f32.mrf.mxu0  ;;  %v2138_v15 = vpop.f32.mrf.mxu1 }
 0x197   : > { %v1325_v16 = vadd.f32 %v1321_v10, %v1316_v12  ;;  %v2045_v11 = vld [vmem:[%s2699_s3 + $0x10] sm:$0xf] }
 0x198   : > { %v1267_v17 = vpop.f32.mrf.mxu0  ;;  %v1311_v20 = vpop.f32.mrf.mxu1 }
 0x199   : > { %v1314_v19 = vadd.f32 %v1267_v17, %v1189_v14  ;;  %v1328_v21 = vmax.f32 %v1325_v16, 0.0 }
 0x19a   : > { %v1269_v22 = vpop.f32.mrf.mxu0  ;;  %v2139_v25 = vpop.f32.mrf.mxu1 }
 0x19b   : > { %v1323_v23 = vadd.f32 %v1321_v10, %v1314_v19  ;;  %v1315_v24 = vadd.f32 %v1269_v22, %v1190_v18  ;;  %v2066_v26 = vpack.c.bf16 %v1328_v21, %v1328_v21  ;;  %v2051_v22 = vld [vmem:[%s2699_s3 + $0x18] sm:$0xf] }
 0x19c   : > { %v1271_v27 = vpop.f32.mrf.mxu0 }
 0x19d   : > { %v1324_v28 = vadd.f32 %v1321_v10, %v1315_v24  ;;  %1344 = vst.msk [vmem:[#allocation2 + $0x8] sm:$0xf] %vm1343_vm11, %v2066_v26  ;;  %v1326_v30 = vmax.f32 %v1323_v23, 0.0  ;;  %v2054_v23 = vld [vmem:[%s2699_s3 + $0x1c] sm:$0xf] }
 0x19e   : > { %v1272_v29 = vpop.f32.mrf.mxu0 }
 0x19f   : > { %v1327_v31 = vmax.f32 %v1324_v28, 0.0  ;;  %v2202_v32 = vpack.c.bf16 %v1326_v30, %v1326_v30  ;;  %v2057_v30 = vld [vmem:[%s2699_s3 + $0x20] sm:$0xf] }
 0x1a1   : > { %v2203_v33 = vpack.c.bf16 %v1327_v31, %v1327_v31  ;;  %v1422_v35 = vsel %vm1370_vm12, %v2202_v32, 0 }
 0x1a3   : > { %2037 = vmatprep.subr.msk.bf16.mxu1 %vm1370_vm12, %v2203_v33 }
 0x1a4   : > { %v2201_v34 = vld [vmem:[#allocation2 + $0x8] ss:$0 sps:$4 sm:$0xff]   ;;  %1442 = vmatpush1.bf16.msra.mxu1 %v1422_v35 }
 0x1a5   : > { %1474 = vrot.lane.b32.xlu1 %v2201_v34, %s2271_s11  ;;  %1362 = vrot.lane.b32.xlu0 %v2201_v34, %s2270_s10 }
 0x1a7   : > { %2038 = vmatmul.mubr.msk.bf16.vlgmr.msra.gmra.mxu1 %vm1366_vm13, %v1346_v36 }
 0x1a8   : > { %1581 = vmatprep.mubr.bf16.mxu1 %v2269_v6 }
 0x1a9   : > { %1598 = vrot.lane.b32.xlu1 %v2201_v34, %s2273_s13  ;;  %1536 = vrot.lane.b32.xlu0 %v2201_v34, %s2272_s12 }
 0x1ad   : > { %1722 = vrot.lane.b32.xlu1 %v2201_v34, %s2275_s15  ;;  %1660 = vrot.lane.b32.xlu0 %v2201_v34, %s2274_s14 }
 0x1b1   : > { %1358 = vrot.lane.b32.xlu1 %v2202_v32, %s2270_s10  ;;  %1784 = vrot.lane.b32.xlu0 %v2201_v34, %s2276_s16 }
 0x1b5   : > { %1360 = vrot.lane.b32.xlu1 %v2203_v33, %s2270_s10  ;;  %1472 = vrot.lane.b32.xlu0 %v2203_v33, %s2271_s11 }
 0x1b9   : > { %1470 = vrot.lane.b32.xlu1 %v2202_v32, %s2271_s11  ;;  %1532 = vrot.lane.b32.xlu0 %v2202_v32, %s2272_s12 }
 0x1bd   : > { %1534 = vrot.lane.b32.xlu1 %v2203_v33, %s2272_s12  ;;  %1596 = vrot.lane.b32.xlu0 %v2203_v33, %s2273_s13  ;;  %s215_s12 = sand.u32 1, %s2256_s19  }
 0x1be   : > { %s1915_s23 = scalar_lea.sflag [#allocation4], %s215_s12 }
 0x1c1   : > { %1594 = vrot.lane.b32.xlu1 %v2202_v32, %s2273_s13  ;;  %1656 = vrot.lane.b32.xlu0 %v2202_v32, %s2274_s14  ;;  %s1992_s13 = sshll.u32 %s215_s12, 4 }
 0x1c5   : > { %1658 = vrot.lane.b32.xlu1 %v2203_v33, %s2274_s14  ;;  %1720 = vrot.lane.b32.xlu0 %v2203_v33, %s2275_s15  ;;  %s2067_s14 = sshll.u32 %s2330_s22, 8  ;;  %s2278_s22 = smov [#allocation3]  }
 0x1c6   : > { %s1927_s9 = scalar_lea.hbm %s2701_s5, %s2067_s14  ;;  %s2208_s26 = sshll.u32 %s2278_s22, 4  ;;  %s2209_s26 = int_to_ptr.vmem [resolvable:$false] %s2208_s26 }
 0x1c7   : > { %s2210_s30 = scalar_lea.vmem %s2209_s26, 512 }
 0x1c9   : > { %1718 = vrot.lane.b32.xlu1 %v2202_v32, %s2275_s15  ;;  %1780 = vrot.lane.b32.xlu0 %v2202_v32, %s2276_s16  ;;  %s217_s15 = scalar_lea.vmem [#allocation3], %s1992_s13 }
 0x1cd   : > { %1782 = vrot.lane.b32.xlu1 %v2203_v33, %s2276_s16  ;;  %1844 = vrot.lane.b32.xlu0 %v2203_v33, %s2277_s17  ;;  %s1929_s16 = sshll.u32 %s217_s15, 4  ;;  %s1930_s16 = int_to_ptr.vmem [resolvable:$true] %s1929_s16 }
 0x1ce   : > { %s2204_s25 = scalar_lea.vmem %s1930_s16, 256  ;;  %p2211_p0 = scmp.lt.s32.totalorder %s1930_s16, %s2209_s26 }
 0x1cf   : > { %p2205_p11 = scmp.ne.s32.totalorder %s1930_s16, %s2204_s25  ;;  %p2212_p1 = scmp.lt.s32.totalorder %s2210_s30, %s2204_s25 }
 0x1d1   : > { %1842 = vrot.lane.b32.xlu1 %v2202_v32, %s2277_s17  ;;  %1905 = vperm.xlu0 %2192, %v1902_v37   ;;  %p2206_p12 = pnand %p2205_p11, %p2347_p5  ;;  %p2213_p2 = por %p2212_p1, %p2211_p0 }
 0x1d3   : > { %p2207_p13 = pneg %p2206_p12 }
 0x1d5   : > { %1846 = vrot.lane.b32.xlu1 %v2201_v34, %s2277_s17  ;;  %p2214_p3 = pnand %p2213_p2, %p2207_p13 }
 0x217   : > { %v1475_v38 = vpop.permute.xlu1 %1474  ;;  %v1363_v39 = vpop.permute.xlu0 %1362 }
 0x21b   : > { %v1599_v40 = vpop.permute.xlu1 %1598  ;;  %v1537_v41 = vpop.permute.xlu0 %1536 }
 0x21f   : > { %v1723_v42 = vpop.permute.xlu1 %1722  ;;  %v1661_v43 = vpop.permute.xlu0 %1660 }
 0x223   : > { %v1359_v44 = vpop.permute.xlu1 %1358  ;;  %v1785_v45 = vpop.permute.xlu0 %1784 }
 0x227   : > { %v1361_v46 = vpop.permute.xlu1 %1360  ;;  %v1473_v47 = vpop.permute.xlu0 %1472 }
 0x228   : > { %v1364_v48 = vsel %vm251_vm2, %v1359_v44, %v1361_v46  ;;  %v1365_v49 = vsel %vm251_vm2, %v1361_v46, %v1363_v39  ;;  %v1477_v51 = vsel %vm468_vm4, %v1473_v47, %v1475_v38 }
 0x229   : > { %v1372_v50 = vsel %vm1370_vm12, %v1364_v48, 0  ;;  %2035 = vmatprep.subr.msk.bf16.mxu0 %vm1370_vm12, %v1365_v49 }
 0x22a   : > { %1392 = vmatpush1.bf16.msra.mxu0 %v1372_v50 }
 0x22b   : > { %v1471_v53 = vpop.permute.xlu1 %1470  ;;  %2040 = vmatprep.subr.msk.bf16.mxu0 %vm1370_vm12, %v1477_v51  ;;  %v1533_v55 = vpop.permute.xlu0 %1532 }
 0x22c   : > { %v1476_v56 = vsel %vm468_vm4, %v1471_v53, %v1473_v47 }
 0x22d   : > { %v1482_v58 = vsel %vm1370_vm12, %v1476_v56, 0  ;;  %2036 = vmatmul.mubr.msk.bf16.vlgmr.msra.gmra.mxu0 %vm1366_vm13, %v2031_v52 }
 0x22e   : > { %1502 = vmatpush1.bf16.msra.mxu0 %v1482_v58  ;;  %1519 = vmatprep.mubr.bf16.mxu0 %v2269_v6 }
 0x22f   : > { %v1535_v59 = vpop.permute.xlu1 %1534  ;;  %v1597_v61 = vpop.permute.xlu0 %1596 }
 0x230   : > { %v1538_v62 = vsel %vm593_vm5, %v1533_v55, %v1535_v59  ;;  %v1539_v0 = vsel %vm593_vm5, %v1535_v59, %v1537_v41  ;;  %v1601_v54 = vsel %vm718_vm6, %v1597_v61, %v1599_v40 }
 0x231   : > { %v1544_v60 = vsel %vm1370_vm12, %v1538_v62, 0  ;;  %2043 = vmatprep.subr.msk.bf16.mxu1 %vm1370_vm12, %v1539_v0  ;;  %2046 = vmatprep.subr.msk.bf16.mxu0 %vm1370_vm12, %v1601_v54 }
 0x232   : > { %1564 = vmatpush1.bf16.msra.mxu1 %v1544_v60 }
 0x233   : > { %v1595_v2 = vpop.permute.xlu1 %1594  ;;  %v1657_v4 = vpop.permute.xlu0 %1656 }
 0x234   : > { %v1600_v5 = vsel %vm718_vm6, %v1595_v2, %v1597_v61 }
 0x235   : > { %v1606_v7 = vsel %vm1370_vm12, %v1600_v5, 0  ;;  %2041 = vmatmul.mubr.msk.bf16.vlgmr.msra.gmra.mxu0 %vm1366_vm13, %v2039_v3  ;;  %2044 = vmatmul.mubr.msk.bf16.vlgmr.msra.gmra.mxu1 %vm1366_vm13, %v2042_v63 }
 0x236   : > { %1626 = vmatpush1.bf16.msra.mxu0 %v1606_v7  ;;  %1643 = vmatprep.mubr.bf16.mxu0 %v2269_v6 }
 0x237   : > { %v1659_v8 = vpop.permute.xlu1 %1658  ;;  %v1721_v57 = vpop.permute.xlu0 %1720  ;;  %1705 = vmatprep.mubr.bf16.mxu1 %v2269_v6 }
 0x238   : > { %v1662_v1 = vsel %vm843_vm7, %v1657_v4, %v1659_v8  ;;  %v1663_v9 = vsel %vm843_vm7, %v1659_v8, %v1661_v43  ;;  %v1725_v10 = vsel %vm968_vm8, %v1721_v57, %v1723_v42 }
 0x239   : > { %v1668_v12 = vsel %vm1370_vm12, %v1662_v1, 0  ;;  %2049 = vmatprep.subr.msk.bf16.mxu1 %vm1370_vm12, %v1663_v9  ;;  %2052 = vmatprep.subr.msk.bf16.mxu0 %vm1370_vm12, %v1725_v10 }
 0x23a   : > { %1688 = vmatpush1.bf16.msra.mxu1 %v1668_v12 }
 0x23b   : > { %v1719_v14 = vpop.permute.xlu1 %1718  ;;  %v1781_v17 = vpop.permute.xlu0 %1780 }
 0x23c   : > { %v1724_v15 = vsel %vm968_vm8, %v1719_v14, %v1721_v57 }
 0x23d   : > { %v1730_v16 = vsel %vm1370_vm12, %v1724_v15, 0  ;;  %2047 = vmatmul.mubr.msk.bf16.vlgmr.msra.gmra.mxu0 %vm1366_vm13, %v2045_v11  ;;  %2050 = vmatmul.mubr.msk.bf16.vlgmr.msra.gmra.mxu1 %vm1366_vm13, %v2048_v13 }
 0x23e   : > { %1750 = vmatpush1.bf16.msra.mxu0 %v1730_v16  ;;  %1767 = vmatprep.mubr.bf16.mxu0 %v2269_v6 }
 0x23f   : > { %v1783_v18 = vpop.permute.xlu1 %1782  ;;  %1829 = vmatprep.mubr.bf16.mxu1 %v2269_v6  ;;  %v1845_v25 = vpop.permute.xlu0 %1844 }
 0x240   : > { %v1786_v19 = vsel %vm1093_vm9, %v1781_v17, %v1783_v18  ;;  %v1787_v20 = vsel %vm1093_vm9, %v1783_v18, %v1785_v45 }
 0x241   : > { %v1792_v21 = vsel %vm1370_vm12, %v1786_v19, 0  ;;  %2055 = vmatprep.subr.msk.bf16.mxu1 %vm1370_vm12, %v1787_v20 }
 0x242   : > { %1812 = vmatpush1.bf16.msra.mxu1 %v1792_v21 }
 0x243   : > { %v1843_v24 = vpop.permute.xlu1 %1842 }
 0x244   : > { %v1848_v26 = vsel %vm1218_vm10, %v1843_v24, %v1845_v25 }
 0x245   : > { %2053 = vmatmul.mubr.msk.bf16.vlgmr.msra.gmra.mxu0 %vm1366_vm13, %v2051_v22  ;;  %2056 = vmatmul.mubr.msk.bf16.vlgmr.msra.gmra.mxu1 %vm1366_vm13, %v2054_v23  ;;  %v1854_v29 = vsel %vm1370_vm12, %v1848_v26, 0 }
 0x246   : > { %1891 = vmatprep.mubr.bf16.mxu0 %v2269_v6 }
 0x247   : > { %v1847_v27 = vpop.permute.xlu1 %1846 }
 0x248   : > { %v1849_v28 = vsel %vm1218_vm10, %v1845_v25, %v1847_v27 }
 0x249   : > { %2058 = vmatprep.subr.msk.bf16.mxu0 %vm1370_vm12, %v1849_v28 }
 0x24a   : > { %1874 = vmatpush1.bf16.msra.mxu0 %v1854_v29 }
 0x24c   : > { %v1906_v15 = vpop.permute.xlu0 %1905 }
 0x24d   : > { %2059 = vmatmul.mubr.msk.bf16.vlgmr.msra.gmra.mxu0 %vm1366_vm13, %v2057_v30 }
 0x267   : > { %v1461_v31 = vpop.f32.mrf.mxu1 }
 0x269   : > { %v1463_v32 = vpop.f32.mrf.mxu1 }
 0x26b   : > { %v1465_v33 = vpop.f32.mrf.mxu1 }
 0x26d   : > { %v1466_v34 = vpop.f32.mrf.mxu1 }
 0x2ed   : > { %v1411_v35 = vpop.f32.mrf.mxu0 }
 0x2ee   : > { %v1462_v44 = vadd.f32 %v1461_v31, %v1411_v35 }
 0x2ef   : > { %v1413_v6 = vpop.f32.mrf.mxu0 }
 0x2f0   : > { %v1464_v47 = vadd.f32 %v1463_v32, %v1413_v6 }
 0x2f1   : > { %v1415_v36 = vpop.f32.mrf.mxu0 }
 0x2f3   : > { %v1416_v37 = vpop.f32.mrf.mxu0 }
 0x2f5   : > { %v1521_v38 = vpop.f32.mrf.mxu0  ;;  %v1583_v39 = vpop.f32.mrf.mxu1 }
 0x2f6   : > { %v1528_v48 = vadd.f32 %v1521_v38, %v1462_v44 }
 0x2f7   : > { %v1523_v40 = vpop.f32.mrf.mxu0  ;;  %v1585_v41 = vpop.f32.mrf.mxu1 }
 0x2f8   : > { %v1529_v51 = vadd.f32 %v1523_v40, %v1464_v47  ;;  %v1590_v55 = vadd.f32 %v1583_v39, %v1528_v48 }
 0x2f9   : > { %v1525_v42 = vpop.f32.mrf.mxu0  ;;  %v1587_v43 = vpop.f32.mrf.mxu1 }
 0x2fa   : > { %v1591_v59 = vadd.f32 %v1585_v41, %v1529_v51 }
 0x2fb   : > { %v1526_v45 = vpop.f32.mrf.mxu0  ;;  %v1588_v46 = vpop.f32.mrf.mxu1 }
 0x2fd   : > { %v1645_v49 = vpop.f32.mrf.mxu0  ;;  %v1707_v50 = vpop.f32.mrf.mxu1 }
 0x2fe   : > { %v1652_v61 = vadd.f32 %v1645_v49, %v1590_v55 }
 0x2ff   : > { %v1647_v52 = vpop.f32.mrf.mxu0  ;;  %v1709_v53 = vpop.f32.mrf.mxu1 }
 0x300   : > { %v1653_v54 = vadd.f32 %v1647_v52, %v1591_v59  ;;  %v1714_v63 = vadd.f32 %v1707_v50, %v1652_v61 }
 0x301   : > { %v1649_v56 = vpop.f32.mrf.mxu0  ;;  %v1711_v58 = vpop.f32.mrf.mxu1 }
 0x302   : > { %v1715_v5 = vadd.f32 %v1709_v53, %v1653_v54 }
 0x303   : > { %v1650_v62 = vpop.f32.mrf.mxu0  ;;  %v1712_v0 = vpop.f32.mrf.mxu1 }
 0x305   : > { %v1769_v60 = vpop.f32.mrf.mxu0  ;;  %v1831_v3 = vpop.f32.mrf.mxu1 }
 0x306   : > { %v1776_v7 = vadd.f32 %v1769_v60, %v1714_v63 }
 0x307   : > { %v1771_v2 = vpop.f32.mrf.mxu0  ;;  %v1833_v4 = vpop.f32.mrf.mxu1 }
 0x308   : > { %v1777_v1 = vadd.f32 %v1771_v2, %v1715_v5  ;;  %v1838_v12 = vadd.f32 %v1831_v3, %v1776_v7 }
 0x309   : > { %v1773_v8 = vpop.f32.mrf.mxu0  ;;  %v1835_v57 = vpop.f32.mrf.mxu1 }
 0x30a   : > { %v1839_v13 = vadd.f32 %v1833_v4, %v1777_v1 }
 0x30b   : > { %v1774_v9 = vpop.f32.mrf.mxu0  ;;  %v1836_v10 = vpop.f32.mrf.mxu1 }
 0x30d   : > { %v1893_v11 = vpop.f32.mrf.mxu0 }
 0x30e   : > { %v1900_v14 = vadd.f32 %v1893_v11, %v1838_v12 }
 0x30f   : > { %v1895_v16 = vpop.f32.mrf.mxu0 }
 0x310   : > { %v1908_v17 = vadd.f32 %v1906_v15, %v1900_v14  ;;  %v1901_v18 = vadd.f32 %v1895_v16, %v1839_v13 }
 0x311   : > { %v1897_v19 = vpop.f32.mrf.mxu0 }
 0x312   : > { %v1910_v20 = vmax.f32 %v1908_v17, 0.0  ;;  %v1909_v21 = vadd.f32 %v1906_v15, %v1901_v18 }
 0x313   : > { %v1898_v22 = vpop.f32.mrf.mxu0 }
 0x314   : > { %1912 = vst [vmem:[%s217_s15] sm:$0xff] %v1910_v20  ;;  %v1911_v23 = vmax.f32 %v1909_v21, 0.0 }
 0x316   : > { %1913 = vst [vmem:[%s217_s15 + $0x8] sm:$0xff] %v1911_v23 }
 0x317   : > { %2217 = shalt.err (!%p2214_p3)
}
 0x318   : > { %s2218_s6 = scalar_lea.hbm %s1927_s9, 256  ;;  %s2222_s11 = scalar_lea.hbm %s2701_s5, 512 }
 0x319   : > { %p2219_p4 = scmp.ne.s32.totalorder %s1927_s9, %s2218_s6  ;;  %p2223_p9 = scmp.lt.s32.totalorder %s1927_s9, %s2701_s5 }
 0x31a   : > { %p2224_p10 = scmp.lt.s32.totalorder %s2222_s11, %s2218_s6 }
 0x31b   : > { %p2220_p7 = pnand %p2219_p4, %p2347_p5 }
 0x31c   : > { %p2225_p11 = por %p2224_p10, %p2223_p9 }
 0x31d   : > { %p2221_p8 = pneg %p2220_p7 }
 0x31f   : > { %p2226_p12 = pnand %p2225_p11, %p2221_p8 }
 0x321   : > { %2229 = shalt.err (!%p2226_p12)
}
 0x322   : > { %2141 = dma.vmem_to_hbm [thread:$0]  (%p2347_p5), %s1930_s16, 256, %s1927_s9, %s1915_s23  }
 0x323 PF: > { %p2147_p13 = scmp.ge.s32.totalorder %s2264_s21, 2  ;;  %s1941_s14 = sand.u32 1, %s2252_s18  }
 0x324   : > { %s1942_s15 = scalar_lea.sflag [#allocation4], %s1941_s14 }
 0x325   : > { %p2144_p0 = pnand %p2147_p13, %p2351_p6 }
 0x327   : > { %p2145_p1 = pneg %p2144_p0 }
 0x329   : > { %2247 = dma.done.wait (%p2145_p1), %s1942_s15, 256  }
 0x32a   : > { %2249 = vsyncadd (%p2145_p1), %s1942_s15, 4294967040  ;;  %p15_p2 = scmp.ge.s32.totalorder %s2334_s24, 4   ;;  %s2704_s18 = smov %s2256_s19 }
 0x32b   : > { %s2705_s19 = smov %s2260_s20  ;;  %s2706_s20 = smov %s2345_s27 }
 0x32c   : > { %s2707_s21 = smov %s2334_s24  ;;  %17 = sbr.rel (!%p15_p2) target bundleno = 3 (0x3), region = 91 }
 0x331   :  { %1947 = vsyncpa [#allocation4], 1 }
 0x332   :  { %1949 = vsyncpa [#allocation4 + $0x1], 1 }

</bundles_post_ra>
